<compile_context>
chip_gen: v5e
topology: v5e:2x2
jax: 0.10.0
libtpu: 0.0.40
codegen_flags: <defaults>
</compile_context>

<pallas_src>
import jax
import jax.numpy as jnp
from jax import lax
from jax.experimental import pallas as pl
from jax.experimental.pallas import tpu as pltpu


def _choose_tiles(N, C, HW, itemsize, block_budget):
    """Pick (n_tile, hw_tile) for an (n_tile, C, hw_tile) input block.

    n_tile must keep the fused (n_tile, C) output block legal: a multiple of 8
    or the full extent N. hw_tile is HW (contiguous slabs) unless that blows the
    budget and a 128-aligned divisor of HW exists.
    """
    legal_n = [t for t in range(8, N + 1, 8) if N % t == 0]
    if N not in legal_n:
        legal_n.append(N)
    legal_n.sort()

    def pick_n(hw_tile):
        per_n = C * hw_tile * itemsize
        fit = [t for t in legal_n if t * per_n <= block_budget]
        if not fit:
            return legal_n[0]          # smallest legal; limit is raised later
        # Prefer >=2 tiles along N when possible so v7x's two TCs both get work.
        split = [t for t in fit if t <= N // 2]
        return max(split) if split else max(fit)

    hw_tile = HW                       # full spatial extent -> contiguous DMA
    n_tile = pick_n(hw_tile)
    if n_tile * C * hw_tile * itemsize > block_budget:
        # Even the smallest legal n tile is over budget with full HW: split the
        # spatial axis at a lane-aligned divisor if one exists.
        cap_hw = block_budget // max(n_tile * C * itemsize, 1)
        hw_cands = [t for t in range(128, HW, 128) if HW % t == 0 and t <= cap_hw]
        if hw_cands:
            hw_tile = max(hw_cands)
    return n_tile, hw_tile


def se_forward(x, w1, b1, w2, b2):
    """x: (N, C, H, W). w1: (C_mid, C), b1: (C_mid,), w2: (C, C_mid), b2: (C,).

    Returns (N, C, 1, 1) gates = sigmoid(excite(relu(compress(avg_pool(x))))).
    """
    N, C, H, W = x.shape
    C_mid = w1.shape[0]
    HW = H * W
    itemsize = x.dtype.itemsize
    inv_hw = 1.0 / float(HW)

    # ---- per-generation VMEM budgeting -------------------------------------
    try:
        vmem_cap = int(pltpu.get_tpu_info().vmem_capacity_bytes)
    except Exception:
        vmem_cap = 64 * 1024 * 1024          # conservative (v7x per-TensorCore)
    vmem_limit = min(96 * 1024 * 1024, (3 * vmem_cap) // 4)
    block_budget = vmem_limit // 6           # one input block (double-buffered + acc + slack)

    n_tile, hw_tile = _choose_tiles(N, C, HW, itemsize, block_budget)
    use_lane_acc = (hw_tile % 128 == 0)
    acc_lanes = 128 if use_lane_acc else 1

    # Make sure the scoped VMEM limit covers the chosen working set.
    block_bytes = n_tile * C * hw_tile * itemsize
    need = (3 * block_bytes
            + n_tile * C * acc_lanes * 4
            + 16 * int(w1.size + w2.size + b1.size + b2.size)
            + 2 * n_tile * C * itemsize
            + (2 << 20))
    vmem_limit = int(min((9 * vmem_cap) // 10, max(vmem_limit, need)))

    # ---- operands ------------------------------------------------------------
    x3d = x.reshape(N, C, HW)
    w1f = w1.astype(jnp.float32)             # (C_mid, C)
    w2f = w2.astype(jnp.float32)             # (C, C_mid)
    b1f = b1.reshape(1, C_mid).astype(jnp.float32)
    b2f = b2.reshape(1, C).astype(jnp.float32)

    # ---- fused pool + excite kernel ------------------------------------------
    def kernel(x_ref, w1_ref, b1_ref, w2_ref, b2_ref, o_ref, acc_ref):
        hw_i = pl.program_id(1)

        @pl.when(hw_i == 0)
        def _init():
            acc_ref[...] = jnp.zeros_like(acc_ref)

        if use_lane_acc:
            # Pure elementwise (VPU) adds per step; the one cross-lane reduce is
            # deferred to the finalize.
            acc = acc_ref[...]
            for j in range(hw_tile // 128):
                acc = acc + x_ref[:, :, j * 128:(j + 1) * 128].astype(jnp.float32)
            acc_ref[...] = acc
        else:
            acc_ref[...] += jnp.sum(x_ref[...].astype(jnp.float32), axis=-1,
                                    keepdims=True)

        @pl.when(hw_i == pl.num_programs(1) - 1)
        def _finalize():
            pooled = jnp.sum(acc_ref[...], axis=-1) * inv_hw          # (n_tile, C)
            dn = (((1,), (1,)), ((), ()))                             # contract last dims
            h = lax.dot_general(pooled, w1_ref[...], dn,
                                preferred_element_type=jnp.float32) + b1_ref[...]
            h = jnp.maximum(h, 0.0)
            o = lax.dot_general(h, w2_ref[...], dn,
                                preferred_element_type=jnp.float32) + b2_ref[...]
            o_ref[...] = jax.nn.sigmoid(o).astype(o_ref.dtype)

    x_spec_kwargs = {}
    if hw_tile < HW and hw_tile * itemsize < 1024:
        # Forced into short strided per-row DMA segments: deepen buffering so the
        # DMA queue stays full.
        x_spec_kwargs["pipeline_mode"] = pl.Buffered(3)
    x_spec = pl.BlockSpec((n_tile, C, hw_tile), lambda n, h: (n, 0, h),
                          **x_spec_kwargs)

    gates = pl.pallas_call(
        kernel,
        out_shape=jax.ShapeDtypeStruct((N, C), x.dtype),
        grid=(N // n_tile, HW // hw_tile),
        in_specs=[
            x_spec,
            pl.BlockSpec((C_mid, C), lambda n, h: (0, 0)),
            pl.BlockSpec((1, C_mid), lambda n, h: (0, 0)),
            pl.BlockSpec((C, C_mid), lambda n, h: (0, 0)),
            pl.BlockSpec((1, C), lambda n, h: (0, 0)),
        ],
        out_specs=pl.BlockSpec((n_tile, C), lambda n, h: (n, 0)),
        scratch_shapes=[pltpu.VMEM((n_tile, C, acc_lanes), jnp.float32)],
        compiler_params=pltpu.CompilerParams(
            dimension_semantics=("parallel", "arbitrary"),
            vmem_limit_bytes=vmem_limit),
    )(x3d, w1f, b1f, w2f, b2f)

    return gates.reshape(N, C, 1, 1)


if __name__ == "__main__":
    # Module config: SE(in_chnls=4, ratio=2)  ->  compress: 4->2, excitation: 2->4
    N, C, H, W = 2, 4, 16, 16
    ratio = 2
    C_mid = C // ratio

    key = jax.random.PRNGKey(0)
    kx, kw1, kb1, kw2, kb2 = jax.random.split(key, 5)

    x = jax.random.normal(kx, (N, C, H, W), dtype=jnp.float32)
    # Conv2d(C, C_mid, 1): weight (C_mid, C, 1, 1) -> stored as (C_mid, C)
    w1 = jax.random.normal(kw1, (C_mid, C), dtype=jnp.float32) * 0.1
    b1 = jax.random.normal(kb1, (C_mid,), dtype=jnp.float32) * 0.1
    # Conv2d(C_mid, C, 1): weight (C, C_mid, 1, 1) -> stored as (C, C_mid)
    w2 = jax.random.normal(kw2, (C, C_mid), dtype=jnp.float32) * 0.1
    b2 = jax.random.normal(kb2, (C,), dtype=jnp.float32) * 0.1

    out = se_forward(x, w1, b1, w2, b2)
    jax.block_until_ready(out)

    # Pure-JAX reference check
    pooled_ref = jnp.mean(x, axis=(2, 3))                        # (N, C)
    h_ref = jnp.maximum(pooled_ref @ w1.T + b1, 0.0)             # (N, C_mid)
    ref = jax.nn.sigmoid(h_ref @ w2.T + b2).reshape(N, C, 1, 1)  # (N, C, 1, 1)
    assert out.shape == (N, C, 1, 1)
    assert jnp.allclose(out, ref, atol=1e-5, rtol=1e-5)

    print("KERNEL_OK")
</pallas_src>

<mosaic_0001>
module attributes {stable_mosaic.version = 11 : i64} {
  func.func @kernel(%arg0: i32, %arg1: i32, %arg2: memref<2x4x256xf32, #tpu.memory_space<vmem>>, %arg3: memref<2x4xf32, #tpu.memory_space<vmem>>, %arg4: memref<1x2xf32, #tpu.memory_space<vmem>>, %arg5: memref<4x2xf32, #tpu.memory_space<vmem>>, %arg6: memref<1x4xf32, #tpu.memory_space<vmem>>, %arg7: memref<2x4xf32, #tpu.memory_space<vmem>>, %arg8: memref<2x4x128xf32, #tpu.memory_space<vmem>>) attributes {dimension_semantics = [#tpu.dimension_semantics<parallel>, #tpu.dimension_semantics<arbitrary>], iteration_bounds = array<i64: 1, 1>, scalar_prefetch = 0 : i64, scratch_operands = 1 : i64, tpu.core_type = #tpu.core_type<tc>, window_params = [{transform_indices = @transform_0, window_bounds = array<i64: 2, 4, 256>}, {pipeline_mode = #tpu.pipeline_mode<synchronous>, transform_indices = @transform_1, window_bounds = array<i64: 2, 4>}, {pipeline_mode = #tpu.pipeline_mode<synchronous>, transform_indices = @transform_2, window_bounds = array<i64: 1, 2>}, {pipeline_mode = #tpu.pipeline_mode<synchronous>, transform_indices = @transform_3, window_bounds = array<i64: 4, 2>}, {pipeline_mode = #tpu.pipeline_mode<synchronous>, transform_indices = @transform_4, window_bounds = array<i64: 1, 4>}, {transform_indices = @transform_5, window_bounds = array<i64: 2, 4>}]} {
    %c0_i32 = arith.constant 0 : i32
    %0 = arith.cmpi eq, %arg1, %c0_i32 : i32
    %1 = arith.extui %0 : i1 to i32
    %c0_i32_0 = arith.constant 0 : i32
    %2 = arith.cmpi ne, %1, %c0_i32_0 : i32
    scf.if %2 {
      %cst = arith.constant 0.000000e+00 : f32
      %12 = vector.broadcast %cst : f32 to vector<2x4x128xf32>
      %c0_13 = arith.constant 0 : index
      %c0_14 = arith.constant 0 : index
      %c0_15 = arith.constant 0 : index
      %13 = vector.load %arg8[%c0_13, %c0_14, %c0_15] : memref<2x4x128xf32, #tpu.memory_space<vmem>>, vector<2x4x128xf32>
      tpu.vector_store %arg8[%c0_13, %c0_14, %c0_15], %12 {strides = array<i32>} : memref<2x4x128xf32, #tpu.memory_space<vmem>>, vector<2x4x128xf32>,
    } else {
    }
    %c0 = arith.constant 0 : index
    %c0_1 = arith.constant 0 : index
    %c0_2 = arith.constant 0 : index
    %3 = vector.load %arg8[%c0, %c0_1, %c0_2] : memref<2x4x128xf32, #tpu.memory_space<vmem>>, vector<2x4x128xf32>
    %c0_3 = arith.constant 0 : index
    %c0_4 = arith.constant 0 : index
    %c0_5 = arith.constant 0 : index
    %4 = vector.load %arg2[%c0_3, %c0_4, %c0_5] : memref<2x4x256xf32, #tpu.memory_space<vmem>>, vector<2x4x128xf32>
    %5 = arith.addf %3, %4 : vector<2x4x128xf32>
    %c0_6 = arith.constant 0 : index
    %c0_7 = arith.constant 0 : index
    %c128 = arith.constant 128 : index
    %6 = vector.load %arg2[%c0_6, %c0_7, %c128] : memref<2x4x256xf32, #tpu.memory_space<vmem>>, vector<2x4x128xf32>
    %7 = arith.addf %5, %6 : vector<2x4x128xf32>
    %c0_8 = arith.constant 0 : index
    %c0_9 = arith.constant 0 : index
    %c0_10 = arith.constant 0 : index
    %8 = vector.load %arg8[%c0_8, %c0_9, %c0_10] : memref<2x4x128xf32, #tpu.memory_space<vmem>>, vector<2x4x128xf32>
    tpu.vector_store %arg8[%c0_8, %c0_9, %c0_10], %7 {strides = array<i32>} : memref<2x4x128xf32, #tpu.memory_space<vmem>>, vector<2x4x128xf32>,
    %c0_i32_11 = arith.constant 0 : i32
    %9 = arith.cmpi eq, %arg1, %c0_i32_11 : i32
    %10 = arith.extui %9 : i1 to i32
    %c0_i32_12 = arith.constant 0 : i32
    %11 = arith.cmpi ne, %10, %c0_i32_12 : i32
    scf.if %11 {
      %c0_13 = arith.constant 0 : index
      %c0_14 = arith.constant 0 : index
      %c0_15 = arith.constant 0 : index
      %12 = vector.load %arg8[%c0_13, %c0_14, %c0_15] : memref<2x4x128xf32, #tpu.memory_space<vmem>>, vector<2x4x128xf32>
      %cst = arith.constant dense<0.000000e+00> : vector<2x4xf32>
      %13 = vector.multi_reduction <add>, %12, %cst [2] : vector<2x4x128xf32> to vector<2x4xf32>
      %cst_16 = arith.constant 3.906250e-03 : f32
      %14 = vector.broadcast %cst_16 : f32 to vector<2x4xf32>
      %15 = arith.mulf %13, %14 : vector<2x4xf32>
      %c0_17 = arith.constant 0 : index
      %c0_18 = arith.constant 0 : index
      %16 = vector.load %arg3[%c0_17, %c0_18] : memref<2x4xf32, #tpu.memory_space<vmem>>, vector<2x4xf32>
      %cst_19 = arith.constant dense<0.000000e+00> : vector<2x2xf32>
      %17 = tpu.matmul %15, %16, %cst_19 {dimension_numbers = #tpu.dot_dimension_numbers<[1], [1], [0], [0], [0, 0, 1, 0], [], []>} : vector<2x4xf32>, vector<2x4xf32>, vector<2x2xf32> -> vector<2x2xf32>
      %c0_20 = arith.constant 0 : index
      %c0_21 = arith.constant 0 : index
      %18 = vector.load %arg4[%c0_20, %c0_21] : memref<1x2xf32, #tpu.memory_space<vmem>>, vector<1x2xf32>
      %19 = vector.broadcast %18 : vector<1x2xf32> to vector<2x2xf32>
      %20 = arith.addf %17, %19 : vector<2x2xf32>
      %cst_22 = arith.constant 0.000000e+00 : f32
      %21 = vector.broadcast %cst_22 : f32 to vector<2x2xf32>
      %22 = arith.maximumf %20, %21 : vector<2x2xf32>
      %c0_23 = arith.constant 0 : index
      %c0_24 = arith.constant 0 : index
      %23 = vector.load %arg5[%c0_23, %c0_24] : memref<4x2xf32, #tpu.memory_space<vmem>>, vector<4x2xf32>
      %cst_25 = arith.constant dense<0.000000e+00> : vector<2x4xf32>
      %24 = tpu.matmul %22, %23, %cst_25 {dimension_numbers = #tpu.dot_dimension_numbers<[1], [1], [0], [0], [0, 0, 1, 0], [], []>} : vector<2x2xf32>, vector<4x2xf32>, vector<2x4xf32> -> vector<2x4xf32>
      %c0_26 = arith.constant 0 : index
      %c0_27 = arith.constant 0 : index
      %25 = vector.load %arg6[%c0_26, %c0_27] : memref<1x4xf32, #tpu.memory_space<vmem>>, vector<1x4xf32>
      %26 = vector.broadcast %25 : vector<1x4xf32> to vector<2x4xf32>
      %27 = arith.addf %24, %26 : vector<2x4xf32>
      %28 = arith.negf %27 : vector<2x4xf32>
      %29 = math.exp %28 : vector<2x4xf32>
      %cst_28 = arith.constant 1.000000e+00 : f32
      %30 = vector.broadcast %cst_28 : f32 to vector<2x4xf32>
      %31 = arith.addf %30, %29 : vector<2x4xf32>
      %32 = arith.divf %30, %31 : vector<2x4xf32>
      %c0_29 = arith.constant 0 : index
      %c0_30 = arith.constant 0 : index
      %33 = vector.load %arg7[%c0_29, %c0_30] : memref<2x4xf32, #tpu.memory_space<vmem>>, vector<2x4xf32>
      tpu.vector_store %arg7[%c0_29, %c0_30], %32 {strides = array<i32>} : memref<2x4xf32, #tpu.memory_space<vmem>>, vector<2x4xf32>,
    } else {
    }
    return
  }
  func.func @transform_0(%arg0: i32, %arg1: i32) -> (i32, i32, i32) {
    %c0_i32 = arith.constant 0 : i32
    %c0_i32_0 = arith.constant 0 : i32
    return %arg0, %c0_i32, %arg1 : i32, i32, i32
  }
  func.func @transform_1(%arg0: i32, %arg1: i32) -> (i32, i32) {
    %c0_i32 = arith.constant 0 : i32
    %c0_i32_0 = arith.constant 0 : i32
    %c0_i32_1 = arith.constant 0 : i32
    return %c0_i32, %c0_i32_0 : i32, i32
  }
  func.func @transform_2(%arg0: i32, %arg1: i32) -> (i32, i32) {
    %c0_i32 = arith.constant 0 : i32
    %c0_i32_0 = arith.constant 0 : i32
    %c0_i32_1 = arith.constant 0 : i32
    return %c0_i32, %c0_i32_0 : i32, i32
  }
  func.func @transform_3(%arg0: i32, %arg1: i32) -> (i32, i32) {
    %c0_i32 = arith.constant 0 : i32
    %c0_i32_0 = arith.constant 0 : i32
    %c0_i32_1 = arith.constant 0 : i32
    return %c0_i32, %c0_i32_0 : i32, i32
  }
  func.func @transform_4(%arg0: i32, %arg1: i32) -> (i32, i32) {
    %c0_i32 = arith.constant 0 : i32
    %c0_i32_0 = arith.constant 0 : i32
    %c0_i32_1 = arith.constant 0 : i32
    return %c0_i32, %c0_i32_0 : i32, i32
  }
  func.func @transform_5(%arg0: i32, %arg1: i32) -> (i32, i32) {
    %c0_i32 = arith.constant 0 : i32
    %c0_i32_0 = arith.constant 0 : i32
    return %arg0, %c0_i32 : i32, i32
  }
}

</mosaic_0001>

<bundles_post_ra>
// kernel: tpu_custom_call.1
= control target key start
LH: loop header
LB: loop body
LE: loop exit
PB: predicated region body
PF: predicated region fallthrough
CT: control target
= control target key end

     0   :  { %10 = vsyncpa [#allocation4], 0  ;;  %s300_s0 = inlined_call_operand.hbm [shape: f32[2,4,256], index: 0, kind: input, shape index: {}]   ;;  %s301_s1 = inlined_call_operand.vmem [shape: f32[2,4], index: 1, kind: input, shape index: {}]   ;;  %s302_s2 = inlined_call_operand.vmem [shape: f32[1,2], index: 2, kind: input, shape index: {}]   ;;  %s303_s3 = inlined_call_operand.vmem [shape: f32[4,2], index: 3, kind: input, shape index: {}]   ;;  %s304_s4 = inlined_call_operand.vmem [shape: f32[1,4], index: 4, kind: input, shape index: {}]   ;;  %s305_s5 = inlined_call_operand.hbm [shape: f32[2,4], index: 5, kind: output, shape index: {}]  }
   0x1   :  { %11 = vsyncpa [#allocation5], 0  ;;  %s16_s20 = sshll.u32 %s300_s0, 4  ;;  %s247_s21 = smov [#allocation3]   ;;  %s17_s20 = int_to_ptr.hbm [resolvable:$true] %s16_s20 }
   0x2   :  { %s18_s22 = sshll.u32 %s247_s21, 4  ;;  %s248_s23 = smov 128   ;;  %s19_s22 = int_to_ptr.vmem [resolvable:$true] %s18_s22 }
   0x3   :  { %s249_s24 = smov 8  }
   0x4   :  { %24 = dma.hbm_to_vmem [thread:$0]  %s17_s20, 256, %s19_s22, [#allocation4], %s248_s23, %s248_s23, %s249_s24  }
   0x5   :  { %243 = dma.done.wait [#allocation4], 256  }
   0x6   :  { %244 = vsyncadd [#allocation4], 4294967040  ;;  %v250_v0 = vmov 0.0   ;;  %v45_v1 = vld [vmem:[#allocation3] sm:$0xf]  ;;  %vm60_vm0 = vcmask 1043456   ;;  %v76_v17 = vlaneseq }
   0x7   :  { %41 = vst [vmem:[#allocation2] sm:$0xf] %v250_v0  ;;  %v46_v2 = vld [vmem:[#allocation3 + $0x8] sm:$0xf]  ;;  %v49_v4 = vld [vmem:[#allocation3 + $0x4] sm:$0xf] }
   0x8   :  { %42 = vst [vmem:[#allocation2 + $0x4] sm:$0xf] %v250_v0  ;;  %v50_v7 = vld [vmem:[#allocation3 + $0xc] sm:$0xf]  ;;  %v69_v15 = vld [vmem:[%s301_s1] sm:$0x3] }
   0x9   :  { %vm82_vm1 = vcmask 31744   ;;  %v77_v18 = vand.u32 127, %v76_v17  ;;  %vm80_vm2 = vcmask 1041409   ;;  %v109_v25 = vld [vmem:[%s303_s3] sm:$0xf]  ;;  %vm114_vm3 = vcmask 15360  }
   0xa   :  { %179 = vmatpush.xpose.msk.msra.mxu0 %vm82_vm1, %v69_v15  ;;  %181 = vmatpush.xpose.msk.msra.mxu1 %vm114_vm3, %v109_v25  ;;  %v189_v26 = vld [vmem:[%s302_s2] ss:$0 sm:$0xff]  ;;  %s251_s2 = smov [#allocation6]   ;;  %vm160_vm7 = vcmask 25600  }
   0xb   :  { %v190_v30 = vld [vmem:[%s304_s4] ss:$0 sm:$0xff]  ;;  %s167_s3 = sshll.u32 %s251_s2, 4  ;;  %s169_s4 = sshll.u32 %s305_s5, 4  ;;  %s168_s3 = int_to_ptr.vmem [resolvable:$true] %s167_s3  ;;  %s170_s4 = int_to_ptr.hbm [resolvable:$true] %s169_s4 }
   0xe   :  { %v43_v3 = vld [vmem:[#allocation2] sm:$0xf] }
   0xf   :  { %v47_v5 = vadd.f32 %v45_v1, %v43_v3  ;;  %v44_v6 = vld [vmem:[#allocation2 + $0x4] sm:$0xf] }
  0x10   :  { %v48_v8 = vadd.f32 %v46_v2, %v44_v6 }
  0x11   :  { %v51_v9 = vadd.f32 %v49_v4, %v47_v5 }
  0x12   :  { %v52_v10 = vadd.f32 %v50_v7, %v48_v8 }
  0x13   :  { %53 = vst [vmem:[#allocation2] sm:$0xf] %v51_v9 }
  0x14   :  { %54 = vst [vmem:[#allocation2 + $0x4] sm:$0xf] %v52_v10 }
  0x1a   :  { %v58_v11 = vld [vmem:[#allocation2] sm:$0xf] }
  0x1b   :  { %v61_v12 = vsel %vm60_vm0, %v58_v11, 0.0  ;;  %v59_v13 = vld [vmem:[#allocation2 + $0x4] sm:$0xf] }
  0x1c   :  { %62 = vadd.xlane.f32.xlu0 %v61_v12  ;;  %v64_v14 = vsel %vm60_vm0, %v59_v13, 0.0 }
  0x24   :  { %65 = vadd.xlane.f32.xlu0 %v64_v14 }
  0x8f   :  { %v63_v16 = vpop.xlane.xlu0 %62 }
  0x90   :  { %v67_v19 = vmul.f32 0.00390625, %v63_v16 }
  0x92   :  { %v78_v22 = vperm.slane %v67_v19, %v77_v18 }
  0x97   :  { %v66_v20 = vpop.xlane.xlu0 %65 }
  0x98   :  { %v68_v21 = vmul.f32 0.00390625, %v66_v20 }
  0x9a   :  { %v79_v23 = vperm.slane %v68_v21, %v77_v18 }
  0x9c   :  { %v81_v24 = vsel %vm80_vm2, %v79_v23, %v78_v22 }
  0x9d   :  { %180 = vmatmul.msk.f32.vlgmr.msra.gmra.mxu0 %vm82_vm1, %v81_v24 }
 0x11a   :  { %v105_v27 = vpop.f32.mrf.mxu0 }
 0x11b   :  { %v106_v28 = vadd.f32 %v189_v26, %v105_v27 }
 0x11d   :  { %v108_v29 = vmax.f32 %v106_v28, 0.0 }
 0x11f   :  { %182 = vmatmul.msk.f32.vlgmr.msra.gmra.mxu1 %vm114_vm3, %v108_v29 }
 0x19c   :  { %v138_v31 = vpop.f32.mrf.mxu1 }
 0x19d   :  { %v139_v32 = vadd.f32 %v190_v30, %v138_v31 }
 0x19f   :  { %v183_v33 = vmul.f32 -1.442695, %v139_v32 }
 0x1a1   :  { %191 = vpow2.f32 %v183_v33 }
 0x1a7   :  { %v192_v34 = vpop.eup %191 }
 0x1a8   :  { %v144_v35 = vadd.f32 1.0, %v192_v34 }
 0x1aa   :  { %193 = vrcp.f32 %v144_v35  ;;  %v156_v39 = vand.u32 2147483648, %v144_v35  ;;  %v154_v41 = vand.u32 2147483647, %v144_v35  ;;  %vm150_vm5 = vweird.f32 %v144_v35 }
 0x1ac   :  { %v157_v43 = vor.u32 1.1754944e-38, %v156_v39  ;;  %vm155_vm8 = vcmp.eq.f32.partialorder %v154_v41, 8.507059e+37 }
 0x1b0   :  { %v194_v36 = vpop.eup %193 }
 0x1b1   :  { %v146_v37 = vmul.f32 %v194_v36, %v144_v35  ;;  %vm151_vm4 = vweird.f32 %v194_v36 }
 0x1b2   :  { %vm152_vm6 = vmor %vm150_vm5, %vm151_vm4 }
 0x1b3   :  { %v147_v38 = vsub.f32 1.0, %v146_v37 }
 0x1b5   :  { %v148_v40 = vmul.f32 %v194_v36, %v147_v38 }
 0x1b7   :  { %v149_v42 = vadd.f32 %v194_v36, %v148_v40 }
 0x1b9   :  { %v153_v44 = vsel %vm152_vm6, %v194_v36, %v149_v42 }
 0x1ba   :  { %v158_v45 = vsel %vm155_vm8, %v157_v43, %v153_v44 }
 0x1bb   :  { %161 = vst.msk [vmem:[#allocation6] sm:$0x3] %vm160_vm7, %v158_v45 }
 0x1bc   :  { %172 = dma.vmem_to_hbm [thread:$0]  %s168_s3, 32, %s170_s4, [#allocation5]  }
 0x1bd   :  { %245 = dma.done.wait [#allocation5], 32  }
 0x1be   :  { %246 = vsyncadd [#allocation5], 4294967264 }
 0x1bf   :  { %177 = vsyncpa [#allocation4], 1 }
 0x1c0   :  { %178 = vsyncpa [#allocation5], 1 }

</bundles_post_ra>
